<compile_context>
chip_gen: v6e
topology: v6e:2x2x1
jax: 0.10.0
libtpu: 0.0.40
codegen_flags: <defaults>
</compile_context>

<pallas_src>
import functools

import jax
import jax.numpy as jnp
from jax.experimental import pallas as pl
from jax.experimental.pallas import tpu as pltpu

LANE = 128
SUBLANE = 8


def _round_up(x, m):
    return (x + m - 1) // m * m


def _cdiv(a, b):
    return -(-a // b)


def _device_kind():
    try:
        return jax.devices()[0].device_kind.lower()
    except Exception:
        return ""


def _default_tm(kind):
    # v5e: 4x128x128 MXU, lower HBM BW -> 128 rows.
    # v6e: 2x256x256 MXU, 128 MiB VMEM -> 512 rows (amortizes per-step weight
    #      push / bias broadcast; weights stay resident, zero extra HBM cost).
    # v7x: 2x256x256 MXU but 64 MiB VMEM/TC -> start at 256, VMEM-fit shrinks.
    if "v5" in kind:
        return 128
    if "v6" in kind:
        return 512
    return 256


def _vmem_cap_bytes(kind):
    if "v7" in kind:
        return 56 << 20   # 64 MiB physical per TensorCore on v7x
    return 100 << 20      # 128 MiB physical on v5e / v6e


def _vmem_need_bytes(tm, th, Dp, Hp):
    """Honest resident-VMEM estimate for one grid step."""
    nh = _cdiv(Hp, th)
    # Resident (single-buffered): w1 bf16, b1/b3 f32 (sublane-padded to 8 rows).
    resident = Dp * Hp * 2 + 8 * Hp * 4 + 8 * Dp * 4
    # w2 column chunk / w3 row chunk / b2 chunk: single-buffered when resident,
    # double-buffered when streamed.
    nbuf = 1 if nh == 1 else 2
    streamed = nbuf * (Hp * th * 2 + th * Dp * 2 + 8 * th * 4)
    # Double-buffered x tile (bf16) and output tile (f32 accumulator).
    io = 2 * tm * Dp * 2 + 2 * tm * Dp * 4
    # h1 bf16 scratch + transient f32 h1, f32 + bf16 h2, f32 dot result.
    scratch = tm * Hp * 2
    temps = tm * Hp * 4 + tm * th * (4 + 2) + tm * Dp * 4
    return resident + streamed + io + scratch + temps


def _choose_tiles(M, Dp, Hp, kind, tm=None, h_chunk=None):
    """Pick (tm, th) so the kernel fits the per-generation VMEM cap."""
    cap = _vmem_cap_bytes(kind)
    tm = _default_tm(kind) if tm is None else int(tm)
    tm = max(SUBLANE, min(_round_up(tm, SUBLANE), _round_up(M, SUBLANE)))

    if h_chunk is not None:
        th = max(LANE, min(_round_up(int(h_chunk), LANE), Hp))
    else:
        th = Hp
        # First stream w2/w3 in smaller H-chunks (w1 + h1 stay resident), ...
        while _vmem_need_bytes(tm, th, Dp, Hp) > cap and th > LANE:
            th = max(LANE, _round_up(th // 2, LANE))
    # ... then shrink the row tile if still over budget.
    while _vmem_need_bytes(tm, th, Dp, Hp) > cap and tm > SUBLANE:
        tm = max(SUBLANE, _round_up(tm // 2, SUBLANE))

    # v7x has two TensorCores: give the "parallel" row axis >= 2 tiles when
    # there are enough rows, otherwise one core idles.
    if "v7" in kind and _cdiv(M, tm) < 2 and M >= 2 * SUBLANE:
        tm = max(SUBLANE, _round_up(_cdiv(M, 2), SUBLANE))

    return tm, th


def _ffwd_kernel(x_ref, w1_ref, b1_ref, w2_ref, b2_ref, w3_ref, b3_ref,
                 o_ref, h1_ref):
    # Grid: (row tiles i [parallel], H chunks j [arbitrary/reduction]).
    # x: (tm, Dp) bf16; w1: (Dp, Hp) bf16 resident; w2 chunk: (Hp, th) bf16;
    # w3 chunk: (th, Dp) bf16; biases f32.  o_ref is the f32 accumulator.
    j = pl.program_id(1)
    nj = pl.num_programs(1)

    @pl.when(j == 0)
    def _():
        h1 = jnp.dot(x_ref[...], w1_ref[...],
                     preferred_element_type=jnp.float32) + b1_ref[...]
        h1_ref[...] = jnp.maximum(h1, 0.0).astype(jnp.bfloat16)
        o_ref[...] = jnp.zeros_like(o_ref)

    h2 = jnp.dot(h1_ref[...], w2_ref[...],
                 preferred_element_type=jnp.float32) + b2_ref[...]
    h2 = jnp.maximum(h2, 0.0).astype(jnp.bfloat16)
    o_ref[...] += jnp.dot(h2, w3_ref[...], preferred_element_type=jnp.float32)

    @pl.when(j == nj - 1)
    def _():
        # Dropout: identity in eval mode (deterministic forward).
        o_ref[...] += b3_ref[...]


def prepare_params(w1, b1, w2, b2, w3, b3):
    """Cast weights to bf16 and zero-pad D/H up to lane (128) multiples.

    Zero padding is exact: padded x columns hit zero rows of w1, padded h1/h2
    columns are relu(0+0)=0 and hit zero rows of the next weight, and padded
    output columns are sliced off in the wrapper."""
    D, H = w1.shape
    Dp = _round_up(D, LANE)
    Hp = _round_up(H, LANE)

    def pad2(a, r, c):
        return jnp.pad(a, ((0, r - a.shape[0]), (0, c - a.shape[1])))

    def pad1(a, n):
        return jnp.pad(a, (0, n - a.shape[0]))

    w1p = pad2(w1, Dp, Hp).astype(jnp.bfloat16)
    w2p = pad2(w2, Hp, Hp).astype(jnp.bfloat16)
    w3p = pad2(w3, Hp, Dp).astype(jnp.bfloat16)
    b1p = pad1(b1, Hp).astype(jnp.float32).reshape(1, Hp)
    b2p = pad1(b2, Hp).astype(jnp.float32).reshape(1, Hp)
    b3p = pad1(b3, Dp).astype(jnp.float32).reshape(1, Dp)
    return w1p, b1p, w2p, b2p, w3p, b3p


@functools.partial(jax.jit, static_argnames=("tm", "h_chunk"))
def positionwise_ffwd(x, w1, b1, w2, b2, w3, b3, *, tm=None, h_chunk=None):
    """Eval-mode forward.  x: (B, T, n_embd) f32; params from prepare_params.

    NOTE: nn.Dropout is the identity here (eval mode); bf16 MXU inputs give
    ~1% numerics vs. the f32 PyTorch reference (intentional)."""
    B, T, D = x.shape
    Dp, Hp = w1.shape
    M = B * T

    kind = _device_kind()
    tm, th = _choose_tiles(M, Dp, Hp, kind, tm=tm, h_chunk=h_chunk)
    ni = _cdiv(M, tm)
    nh = _cdiv(Hp, th)

    x2d = x.reshape(M, D)
    if Dp != D:  # production n_embd should already be a multiple of 128
        x2d = jnp.pad(x2d, ((0, 0), (0, Dp - D)))
    x2d = x2d.astype(jnp.bfloat16)

    need = _vmem_need_bytes(tm, th, Dp, Hp)
    cap = _vmem_cap_bytes(kind)
    vmem_limit = min(cap, max(32 << 20, int(need * 1.4) + (4 << 20)))

    flops = 2 * M * (Dp * Hp + Hp * Hp + Hp * Dp)
    weight_reads = Dp * Hp * 2 + (Hp * Hp + Hp * Dp) * 2 * (ni if nh > 1 else 1)
    bytes_accessed = M * Dp * 2 + weight_reads + (2 * Hp + Dp) * 4 + M * Dp * 4

    def resident(shape, index_map):
        # Constant index_map -> stays in VMEM; no pointless double buffer.
        return pl.BlockSpec(shape, index_map,
                            pipeline_mode=pl.Buffered(buffer_count=1))

    if nh == 1:
        # Everything fits: w2/w3 fully resident, single-buffered.
        w2_spec = resident((Hp, th), lambda i, j: (0, 0))
        b2_spec = resident((1, th), lambda i, j: (0, 0))
        w3_spec = resident((th, Dp), lambda i, j: (0, 0))
    else:
        # Stream w2 column-chunks / w3 row-chunks (double-buffered) so the
        # HxH middle weight never has to be fully resident (v7x, large H).
        w2_spec = pl.BlockSpec((Hp, th), lambda i, j: (0, j))
        b2_spec = pl.BlockSpec((1, th), lambda i, j: (0, j))
        w3_spec = pl.BlockSpec((th, Dp), lambda i, j: (j, 0))

    out2d = pl.pallas_call(
        _ffwd_kernel,
        out_shape=jax.ShapeDtypeStruct((M, Dp), jnp.float32),
        grid_spec=pltpu.PrefetchScalarGridSpec(
            num_scalar_prefetch=0,
            grid=(ni, nh),
            in_specs=[
                pl.BlockSpec((tm, Dp), lambda i, j: (i, 0)),   # x row tile
                resident((Dp, Hp), lambda i, j: (0, 0)),       # w1 (resident)
                resident((1, Hp), lambda i, j: (0, 0)),        # b1
                w2_spec,                                       # w2 (chunked)
                b2_spec,                                       # b2 (chunked)
                w3_spec,                                       # w3 (chunked)
                resident((1, Dp), lambda i, j: (0, 0)),        # b3
            ],
            out_specs=pl.BlockSpec((tm, Dp), lambda i, j: (i, 0)),
            scratch_shapes=[pltpu.VMEM((tm, Hp), jnp.bfloat16)],  # h1
        ),
        compiler_params=pltpu.CompilerParams(
            dimension_semantics=("parallel", "arbitrary"),
            vmem_limit_bytes=vmem_limit,
        ),
        cost_estimate=pl.CostEstimate(
            flops=flops, transcendentals=0, bytes_accessed=bytes_accessed),
    )(x2d, w1, b1, w2, b2, w3, b3)

    if Dp != D:  # skip the extra HBM pass when D is already lane-aligned
        out2d = out2d[:, :D]
    return out2d.reshape(B, T, D).astype(x.dtype)


def init_params(key, n_embd, ffwd_expansion=4, dtype=jnp.float32):
    """Deterministic PyTorch-style (uniform +/- 1/sqrt(fan_in)) init, f32."""
    H = ffwd_expansion * n_embd
    k1, k2, k3, k4, k5, k6 = jax.random.split(key, 6)

    def lin(kw, kb, fan_in, fan_out):
        bound = 1.0 / jnp.sqrt(jnp.asarray(fan_in, dtype))
        w = jax.random.uniform(kw, (fan_in, fan_out), dtype, -bound, bound)
        b = jax.random.uniform(kb, (fan_out,), dtype, -bound, bound)
        return w, b

    w1, b1 = lin(k1, k2, n_embd, H)
    w2, b2 = lin(k3, k4, H, H)
    w3, b3 = lin(k5, k6, H, n_embd)
    return w1, b1, w2, b2, w3, b3


def reference_ffwd_f32(x, w1, b1, w2, b2, w3, b3):
    h1 = jax.nn.relu(x @ w1 + b1)
    h2 = jax.nn.relu(h1 @ w2 + b2)
    return h2 @ w3 + b3


def reference_ffwd_bf16(x, w1, b1, w2, b2, w3, b3):
    """Emulates the kernel's bf16-in / f32-accumulate numerics in plain XLA."""
    B, T, D = x.shape
    xb = x.reshape(-1, D).astype(jnp.bfloat16)
    h1 = jnp.dot(xb, w1.astype(jnp.bfloat16),
                 preferred_element_type=jnp.float32) + b1
    h1 = jnp.maximum(h1, 0.0).astype(jnp.bfloat16)
    h2 = jnp.dot(h1, w2.astype(jnp.bfloat16),
                 preferred_element_type=jnp.float32) + b2
    h2 = jnp.maximum(h2, 0.0).astype(jnp.bfloat16)
    out = jnp.dot(h2, w3.astype(jnp.bfloat16),
                  preferred_element_type=jnp.float32) + b3
    return out.reshape(B, T, D)


if __name__ == "__main__":
    key = jax.random.PRNGKey(0)

    # --- Test 1: tiny shape, weights fully resident (nh == 1) ------------
    n_embd = 32
    B, T = 2, 8
    kx, kp, key = jax.random.split(key, 3)
    x = jax.random.normal(kx, (B, T, n_embd), jnp.float32)
    raw = init_params(kp, n_embd, ffwd_expansion=4)
    prepped = prepare_params(*raw)

    out = jax.block_until_ready(positionwise_ffwd(x, *prepped))
    assert out.shape == (B, T, n_embd)
    assert jnp.allclose(out, reference_ffwd_bf16(x, *raw),
                        atol=1e-2, rtol=1e-2), "T1 mismatch vs bf16 reference"
    assert jnp.allclose(out, reference_ffwd_f32(x, *raw),
                        atol=6e-2, rtol=6e-2), "T1 mismatch vs f32 reference"

    # --- Test 2: H-chunked (streamed w2/w3) path + partial row tile ------
    n_embd2 = 64           # Hp = 256 -> two 128-wide H chunks
    B2, T2 = 2, 24         # M = 48 rows, tm = 32 -> 2 row tiles (2nd partial)
    kx2, kp2 = jax.random.split(key)
    x2 = jax.random.normal(kx2, (B2, T2, n_embd2), jnp.float32)
    raw2 = init_params(kp2, n_embd2, ffwd_expansion=4)
    prepped2 = prepare_params(*raw2)

    out2 = jax.block_until_ready(
        positionwise_ffwd(x2, *prepped2, tm=32, h_chunk=128))
    assert out2.shape == (B2, T2, n_embd2)
    assert jnp.allclose(out2, reference_ffwd_bf16(x2, *raw2),
                        atol=1e-2, rtol=1e-2), "T2 mismatch vs bf16 reference"
    assert jnp.allclose(out2, reference_ffwd_f32(x2, *raw2),
                        atol=6e-2, rtol=6e-2), "T2 mismatch vs f32 reference"

    print("KERNEL_OK")
</pallas_src>

<mosaic_0001>
module attributes {stable_mosaic.version = 11 : i64} {
  func.func @_ffwd_kernel(%arg0: i32, %arg1: i32, %arg2: memref<16x128xbf16, #tpu.memory_space<vmem>>, %arg3: memref<128x128xbf16, #tpu.memory_space<vmem>>, %arg4: memref<1x128xf32, #tpu.memory_space<vmem>>, %arg5: memref<128x128xbf16, #tpu.memory_space<vmem>>, %arg6: memref<1x128xf32, #tpu.memory_space<vmem>>, %arg7: memref<128x128xbf16, #tpu.memory_space<vmem>>, %arg8: memref<1x128xf32, #tpu.memory_space<vmem>>, %arg9: memref<16x128xf32, #tpu.memory_space<vmem>>, %arg10: memref<16x128xbf16, #tpu.memory_space<vmem>>) attributes {dimension_semantics = [#tpu.dimension_semantics<parallel>, #tpu.dimension_semantics<arbitrary>], iteration_bounds = array<i64: 1, 1>, scalar_prefetch = 0 : i64, scratch_operands = 1 : i64, tpu.core_type = #tpu.core_type<tc>, window_params = [{transform_indices = @transform_0, window_bounds = array<i64: 16, 128>}, {pipeline_mode = #tpu.pipeline_mode<synchronous>, transform_indices = @transform_1, window_bounds = array<i64: 128, 128>}, {pipeline_mode = #tpu.pipeline_mode<synchronous>, transform_indices = @transform_2, window_bounds = array<i64: 1, 128>}, {pipeline_mode = #tpu.pipeline_mode<synchronous>, transform_indices = @transform_3, window_bounds = array<i64: 128, 128>}, {pipeline_mode = #tpu.pipeline_mode<synchronous>, transform_indices = @transform_4, window_bounds = array<i64: 1, 128>}, {pipeline_mode = #tpu.pipeline_mode<synchronous>, transform_indices = @transform_5, window_bounds = array<i64: 128, 128>}, {pipeline_mode = #tpu.pipeline_mode<synchronous>, transform_indices = @transform_6, window_bounds = array<i64: 1, 128>}, {transform_indices = @transform_7, window_bounds = array<i64: 16, 128>}]} {
    %c0_i32 = arith.constant 0 : i32
    %0 = arith.cmpi eq, %arg1, %c0_i32 : i32
    %1 = arith.extui %0 : i1 to i32
    %c0_i32_0 = arith.constant 0 : i32
    %2 = arith.cmpi ne, %1, %c0_i32_0 : i32
    scf.if %2 {
      %c0_16 = arith.constant 0 : index
      %c0_17 = arith.constant 0 : index
      %20 = vector.load %arg2[%c0_16, %c0_17] : memref<16x128xbf16, #tpu.memory_space<vmem>>, vector<16x128xbf16>
      %c0_18 = arith.constant 0 : index
      %c0_19 = arith.constant 0 : index
      %21 = vector.load %arg3[%c0_18, %c0_19] : memref<128x128xbf16, #tpu.memory_space<vmem>>, vector<128x128xbf16>
      %cst_20 = arith.constant dense<0.000000e+00> : vector<16x128xf32>
      %22 = tpu.matmul %20, %21, %cst_20 {dimension_numbers = #tpu.dot_dimension_numbers<[1], [0], [0], [1], [0, 0, 1, 1], [], []>} : vector<16x128xbf16>, vector<128x128xbf16>, vector<16x128xf32> -> vector<16x128xf32>
      %c0_21 = arith.constant 0 : index
      %c0_22 = arith.constant 0 : index
      %23 = vector.load %arg4[%c0_21, %c0_22] : memref<1x128xf32, #tpu.memory_space<vmem>>, vector<1x128xf32>
      %24 = vector.broadcast %23 : vector<1x128xf32> to vector<16x128xf32>
      %25 = arith.addf %22, %24 : vector<16x128xf32>
      %cst_23 = arith.constant 0.000000e+00 : f32
      %26 = vector.broadcast %cst_23 : f32 to vector<16x128xf32>
      %27 = arith.maximumf %25, %26 : vector<16x128xf32>
      %28 = arith.truncf %27 : vector<16x128xf32> to vector<16x128xbf16>
      %c0_24 = arith.constant 0 : index
      %c0_25 = arith.constant 0 : index
      %29 = vector.load %arg10[%c0_24, %c0_25] : memref<16x128xbf16, #tpu.memory_space<vmem>>, vector<16x128xbf16>
      tpu.vector_store %arg10[%c0_24, %c0_25], %28 {strides = array<i32>} : memref<16x128xbf16, #tpu.memory_space<vmem>>, vector<16x128xbf16>,
      %cst_26 = arith.constant 0.000000e+00 : f32
      %30 = vector.broadcast %cst_26 : f32 to vector<16x128xf32>
      %c0_27 = arith.constant 0 : index
      %c0_28 = arith.constant 0 : index
      %31 = vector.load %arg9[%c0_27, %c0_28] : memref<16x128xf32, #tpu.memory_space<vmem>>, vector<16x128xf32>
      tpu.vector_store %arg9[%c0_27, %c0_28], %30 {strides = array<i32>} : memref<16x128xf32, #tpu.memory_space<vmem>>, vector<16x128xf32>,
    } else {
    }
    %c0 = arith.constant 0 : index
    %c0_1 = arith.constant 0 : index
    %3 = vector.load %arg10[%c0, %c0_1] : memref<16x128xbf16, #tpu.memory_space<vmem>>, vector<16x128xbf16>
    %c0_2 = arith.constant 0 : index
    %c0_3 = arith.constant 0 : index
    %4 = vector.load %arg5[%c0_2, %c0_3] : memref<128x128xbf16, #tpu.memory_space<vmem>>, vector<128x128xbf16>
    %cst = arith.constant dense<0.000000e+00> : vector<16x128xf32>
    %5 = tpu.matmul %3, %4, %cst {dimension_numbers = #tpu.dot_dimension_numbers<[1], [0], [0], [1], [0, 0, 1, 1], [], []>} : vector<16x128xbf16>, vector<128x128xbf16>, vector<16x128xf32> -> vector<16x128xf32>
    %c0_4 = arith.constant 0 : index
    %c0_5 = arith.constant 0 : index
    %6 = vector.load %arg6[%c0_4, %c0_5] : memref<1x128xf32, #tpu.memory_space<vmem>>, vector<1x128xf32>
    %7 = vector.broadcast %6 : vector<1x128xf32> to vector<16x128xf32>
    %8 = arith.addf %5, %7 : vector<16x128xf32>
    %cst_6 = arith.constant 0.000000e+00 : f32
    %9 = vector.broadcast %cst_6 : f32 to vector<16x128xf32>
    %10 = arith.maximumf %8, %9 : vector<16x128xf32>
    %11 = arith.truncf %10 : vector<16x128xf32> to vector<16x128xbf16>
    %c0_7 = arith.constant 0 : index
    %c0_8 = arith.constant 0 : index
    %12 = vector.load %arg9[%c0_7, %c0_8] : memref<16x128xf32, #tpu.memory_space<vmem>>, vector<16x128xf32>
    %c0_9 = arith.constant 0 : index
    %c0_10 = arith.constant 0 : index
    %13 = vector.load %arg7[%c0_9, %c0_10] : memref<128x128xbf16, #tpu.memory_space<vmem>>, vector<128x128xbf16>
    %cst_11 = arith.constant dense<0.000000e+00> : vector<16x128xf32>
    %14 = tpu.matmul %11, %13, %cst_11 {dimension_numbers = #tpu.dot_dimension_numbers<[1], [0], [0], [1], [0, 0, 1, 1], [], []>} : vector<16x128xbf16>, vector<128x128xbf16>, vector<16x128xf32> -> vector<16x128xf32>
    %15 = arith.addf %12, %14 : vector<16x128xf32>
    %c0_12 = arith.constant 0 : index
    %c0_13 = arith.constant 0 : index
    %16 = vector.load %arg9[%c0_12, %c0_13] : memref<16x128xf32, #tpu.memory_space<vmem>>, vector<16x128xf32>
    tpu.vector_store %arg9[%c0_12, %c0_13], %15 {strides = array<i32>} : memref<16x128xf32, #tpu.memory_space<vmem>>, vector<16x128xf32>,
    %c0_i32_14 = arith.constant 0 : i32
    %17 = arith.cmpi eq, %arg1, %c0_i32_14 : i32
    %18 = arith.extui %17 : i1 to i32
    %c0_i32_15 = arith.constant 0 : i32
    %19 = arith.cmpi ne, %18, %c0_i32_15 : i32
    scf.if %19 {
      %c0_16 = arith.constant 0 : index
      %c0_17 = arith.constant 0 : index
      %20 = vector.load %arg9[%c0_16, %c0_17] : memref<16x128xf32, #tpu.memory_space<vmem>>, vector<16x128xf32>
      %c0_18 = arith.constant 0 : index
      %c0_19 = arith.constant 0 : index
      %21 = vector.load %arg8[%c0_18, %c0_19] : memref<1x128xf32, #tpu.memory_space<vmem>>, vector<1x128xf32>
      %22 = vector.broadcast %21 : vector<1x128xf32> to vector<16x128xf32>
      %23 = arith.addf %20, %22 : vector<16x128xf32>
      %c0_20 = arith.constant 0 : index
      %c0_21 = arith.constant 0 : index
      %24 = vector.load %arg9[%c0_20, %c0_21] : memref<16x128xf32, #tpu.memory_space<vmem>>, vector<16x128xf32>
      tpu.vector_store %arg9[%c0_20, %c0_21], %23 {strides = array<i32>} : memref<16x128xf32, #tpu.memory_space<vmem>>, vector<16x128xf32>,
    } else {
    }
    return
  }
  func.func @transform_0(%arg0: i32, %arg1: i32) -> (i32, i32) {
    %c0_i32 = arith.constant 0 : i32
    %c0_i32_0 = arith.constant 0 : i32
    return %arg0, %c0_i32 : i32, i32
  }
  func.func @transform_1(%arg0: i32, %arg1: i32) -> (i32, i32) {
    %c0_i32 = arith.constant 0 : i32
    %c0_i32_0 = arith.constant 0 : i32
    %c0_i32_1 = arith.constant 0 : i32
    return %c0_i32, %c0_i32_0 : i32, i32
  }
  func.func @transform_2(%arg0: i32, %arg1: i32) -> (i32, i32) {
    %c0_i32 = arith.constant 0 : i32
    %c0_i32_0 = arith.constant 0 : i32
    %c0_i32_1 = arith.constant 0 : i32
    return %c0_i32, %c0_i32_0 : i32, i32
  }
  func.func @transform_3(%arg0: i32, %arg1: i32) -> (i32, i32) {
    %c0_i32 = arith.constant 0 : i32
    %c0_i32_0 = arith.constant 0 : i32
    %c0_i32_1 = arith.constant 0 : i32
    return %c0_i32, %c0_i32_0 : i32, i32
  }
  func.func @transform_4(%arg0: i32, %arg1: i32) -> (i32, i32) {
    %c0_i32 = arith.constant 0 : i32
    %c0_i32_0 = arith.constant 0 : i32
    %c0_i32_1 = arith.constant 0 : i32
    return %c0_i32, %c0_i32_0 : i32, i32
  }
  func.func @transform_5(%arg0: i32, %arg1: i32) -> (i32, i32) {
    %c0_i32 = arith.constant 0 : i32
    %c0_i32_0 = arith.constant 0 : i32
    %c0_i32_1 = arith.constant 0 : i32
    return %c0_i32, %c0_i32_0 : i32, i32
  }
  func.func @transform_6(%arg0: i32, %arg1: i32) -> (i32, i32) {
    %c0_i32 = arith.constant 0 : i32
    %c0_i32_0 = arith.constant 0 : i32
    %c0_i32_1 = arith.constant 0 : i32
    return %c0_i32, %c0_i32_0 : i32, i32
  }
  func.func @transform_7(%arg0: i32, %arg1: i32) -> (i32, i32) {
    %c0_i32 = arith.constant 0 : i32
    %c0_i32_0 = arith.constant 0 : i32
    return %arg0, %c0_i32 : i32, i32
  }
}

</mosaic_0001>

<bundles_post_ra>
// kernel: positionwise_ffwd.1
= control target key start
LH: loop header
LB: loop body
LE: loop exit
PB: predicated region body
PF: predicated region fallthrough
CT: control target
= control target key end

     0   :  { %12 = vsyncpa [#allocation4], 0  ;;  %s788_s0 = inlined_call_operand.vmem [shape: bf16[16,128], index: 0, kind: input, shape index: {}]   ;;  %s789_s1 = inlined_call_operand.hbm [shape: bf16[128,128], index: 1, kind: input, shape index: {}]   ;;  %s790_s2 = inlined_call_operand.vmem [shape: f32[1,128], index: 2, kind: input, shape index: {}]   ;;  %s791_s3 = inlined_call_operand.hbm [shape: bf16[128,128], index: 3, kind: input, shape index: {}]   ;;  %s792_s4 = inlined_call_operand.vmem [shape: f32[1,128], index: 4, kind: input, shape index: {}]   ;;  %s793_s5 = inlined_call_operand.hbm [shape: bf16[128,128], index: 5, kind: input, shape index: {}]   ;;  %s794_s6 = inlined_call_operand.vmem [shape: f32[1,128], index: 6, kind: input, shape index: {}]   ;;  %s795_s7 = inlined_call_operand.vmem [shape: f32[16,128], index: 7, kind: output, shape index: {}]  }
   0x1   :  { %13 = vsyncpa [#allocation6], 0  ;;  %s684_s24 = smov [#allocation5]   ;;  %s685_s26 = smov [#allocation3]  }
   0x2   :  { %s35_s25 = sshll.u32 %s684_s24, 4  ;;  %s21_s27 = sshll.u32 %s685_s26, 4  ;;  %s36_s25 = int_to_ptr.vmem [resolvable:$true] %s35_s25  ;;  %s22_s27 = int_to_ptr.vmem [resolvable:$true] %s21_s27 }
   0x3   :  { %s628_s28 = scalar_lea.vmem %s36_s25, 1024  ;;  %p633_p1 = scmp.lt.s32.totalorder %s36_s25, %s36_s25 }
   0x4   :  { %p629_p0 = scmp.ne.s32.totalorder %s36_s25, %s628_s28  ;;  %p634_p2 = scmp.lt.s32.totalorder %s628_s28, %s628_s28 }
   0x6   :  { %p635_p3 = por %p634_p2, %p633_p1 }
   0x8   :  { %p636_p4 = pnand %p635_p3, %p629_p0 }
   0xa   :  { %639 = shalt.err (!%p636_p4)
}
   0xb   :  { %s686_s29 = smov 64   ;;  %s687_s30 = smov 4  }
   0xc   :  { %41 = dma.hbm_to_vmem [thread:$0]  %s791_s3, 1024, %s36_s25, [#allocation6], %s686_s29, %s686_s29, %s687_s30  }
   0xd   :  { %s648_s10 = scalar_lea.vmem %s22_s27, 1024  ;;  %p653_p6 = scmp.lt.s32.totalorder %s22_s27, %s22_s27 }
   0xe   :  { %p649_p5 = scmp.ne.s32.totalorder %s22_s27, %s648_s10  ;;  %p654_p7 = scmp.lt.s32.totalorder %s648_s10, %s648_s10 }
  0x10   :  { %p655_p8 = por %p654_p7, %p653_p6 }
  0x12   :  { %p656_p9 = pnand %p655_p8, %p649_p5 }
  0x14   :  { %659 = shalt.err (!%p656_p9)
}
  0x15   :  { %27 = dma.hbm_to_vmem [thread:$0]  %s789_s1, 1024, %s22_s27, [#allocation4], %s686_s29, %s686_s29, %s687_s30  }
  0x16   :  { %s688_s13 = smov [#allocation7]  }
  0x17   :  { %s49_s14 = sshll.u32 %s688_s13, 4  ;;  %s50_s14 = int_to_ptr.vmem [resolvable:$true] %s49_s14 }
  0x18   :  { %s668_s15 = scalar_lea.vmem %s50_s14, 1024  ;;  %p673_p11 = scmp.lt.s32.totalorder %s50_s14, %s50_s14 }
  0x19   :  { %p669_p10 = scmp.ne.s32.totalorder %s50_s14, %s668_s15  ;;  %p674_p12 = scmp.lt.s32.totalorder %s668_s15, %s668_s15 }
  0x1b   :  { %p675_p13 = por %p674_p12, %p673_p11 }
  0x1d   :  { %p676_p0 = pnand %p675_p13, %p669_p10 }
  0x1f   :  { %679 = shalt.err (!%p676_p0)
}
  0x20   :  { %55 = dma.hbm_to_vmem [thread:$0]  %s793_s5, 1024, %s50_s14, [#allocation6], %s686_s29, %s686_s29, %s687_s30  }
  0x21   :  { %680 = dma.done.wait [#allocation4], 1024  }
  0x22   :  { %681 = vsyncadd [#allocation4], 4294966272 }
  0x23   :  { %682 = dma.done.wait [#allocation6], 2048  }
  0x24   :  { %683 = vsyncadd [#allocation6], 4294965248  ;;  %v689_v0 = vmov 0.0   ;;  %vm690_vm0 = vmmov 0   ;;  %v594_v1 = vld [vmem:[#allocation3 + $0x38] sm:$0xff]   ;;  %v595_v2 = vld [vmem:[#allocation3 + $0x30] sm:$0xff]  }
  0x25   :  { %527 = vmatprep.subr.bf16.mxu0 %v689_v0  ;;  %543 = vmatprep.mubr.msk.bf16.mxu0 %vm690_vm0, %v689_v0  ;;  %v596_v3 = vld [vmem:[#allocation3 + $0x28] sm:$0xff]   ;;  %v603_v4 = vld [vmem:[#allocation5 + $0x38] sm:$0xff]   ;;  %v597_v5 = vld [vmem:[#allocation3 + $0x20] sm:$0xff]  }
  0x26   :  { %547 = vmatprep.subr.bf16.mxu1 %v689_v0  ;;  %563 = vmatprep.mubr.msk.bf16.mxu1 %vm690_vm0, %v689_v0  ;;  %v604_v6 = vld [vmem:[#allocation5 + $0x30] sm:$0xff]   ;;  %v598_v7 = vld [vmem:[#allocation3 + $0x18] sm:$0xff]   ;;  %v605_v8 = vld [vmem:[#allocation5 + $0x28] sm:$0xff]  }
  0x27   :  { %528 = vmatpush3.bf16.msra.mxu0 %v594_v1  ;;  %548 = vmatpush3.bf16.msra.mxu1 %v603_v4  ;;  %v599_v9 = vld [vmem:[#allocation3 + $0x10] sm:$0xff]   ;;  %v600_v10 = vld [vmem:[#allocation3 + $0x8] sm:$0xff]   ;;  %v601_v11 = vld [vmem:[#allocation3] sm:$0xff]  }
  0x28   :  { %529 = vmatprep.subr.bf16.mxu0 %v689_v0  ;;  %549 = vmatprep.subr.bf16.mxu1 %v689_v0  ;;  %v602_v12 = vld [vmem:[%s788_s0] sm:$0xff]   ;;  %v606_v13 = vld [vmem:[#allocation5 + $0x20] sm:$0xff]   ;;  %v608_v15 = vld [vmem:[#allocation5 + $0x10] sm:$0xff]  }
  0x29   :  { %v607_v14 = vld [vmem:[#allocation5 + $0x18] sm:$0xff]   ;;  %v609_v16 = vld [vmem:[#allocation5 + $0x8] sm:$0xff]   ;;  %v610_v17 = vld [vmem:[#allocation5] sm:$0xff]  }
  0x2a   :  { %v612_v18 = vld [vmem:[#allocation7 + $0x38] sm:$0xff]   ;;  %v613_v19 = vld [vmem:[#allocation7 + $0x30] sm:$0xff]   ;;  %v614_v20 = vld [vmem:[#allocation7 + $0x28] sm:$0xff]  }
  0x2b   :  { %530 = vmatpush3.bf16.msra.mxu0 %v595_v2  ;;  %550 = vmatpush3.bf16.msra.mxu1 %v604_v6  ;;  %v615_v21 = vld [vmem:[#allocation7 + $0x20] sm:$0xff]   ;;  %v616_v22 = vld [vmem:[#allocation7 + $0x18] sm:$0xff]   ;;  %v617_v34 = vld [vmem:[#allocation7 + $0x10] sm:$0xff]  }
  0x2c   :  { %531 = vmatprep.subr.bf16.mxu0 %v689_v0  ;;  %551 = vmatprep.subr.bf16.mxu1 %v689_v0  ;;  %v462_v23 = vld [vmem:[%s790_s2] ss:$0 sm:$0xff]  ;;  %v618_v35 = vld [vmem:[#allocation7 + $0x8] sm:$0xff]   ;;  %v619_v36 = vld [vmem:[#allocation7] sm:$0xff]  }
  0x2d   :  { %v474_v37 = vld [vmem:[%s792_s4] ss:$0 sm:$0xff] }
  0x2e   :  { %v492_v48 = vld [vmem:[%s794_s6] ss:$0 sm:$0xff] }
  0x2f   :  { %532 = vmatpush3.bf16.msra.mxu0 %v596_v3  ;;  %552 = vmatpush3.bf16.msra.mxu1 %v605_v8 }
  0x30   :  { %533 = vmatprep.subr.bf16.mxu0 %v689_v0  ;;  %553 = vmatprep.subr.bf16.mxu1 %v689_v0 }
  0x33   :  { %534 = vmatpush3.bf16.msra.mxu0 %v597_v5  ;;  %554 = vmatpush3.bf16.msra.mxu1 %v606_v13 }
  0x34   :  { %535 = vmatprep.subr.bf16.mxu0 %v689_v0  ;;  %555 = vmatprep.subr.bf16.mxu1 %v689_v0 }
  0x37   :  { %536 = vmatpush3.bf16.msra.mxu0 %v598_v7  ;;  %556 = vmatpush3.bf16.msra.mxu1 %v607_v14 }
  0x38   :  { %537 = vmatprep.subr.bf16.mxu0 %v689_v0  ;;  %557 = vmatprep.subr.bf16.mxu1 %v689_v0 }
  0x3b   :  { %538 = vmatpush3.bf16.msra.mxu0 %v599_v9  ;;  %558 = vmatpush3.bf16.msra.mxu1 %v608_v15 }
  0x3c   :  { %539 = vmatprep.subr.bf16.mxu0 %v689_v0  ;;  %559 = vmatprep.subr.bf16.mxu1 %v689_v0 }
  0x3f   :  { %540 = vmatpush3.bf16.msra.mxu0 %v600_v10  ;;  %560 = vmatpush3.bf16.msra.mxu1 %v609_v16 }
  0x40   :  { %541 = vmatprep.subr.bf16.mxu0 %v689_v0  ;;  %561 = vmatprep.subr.bf16.mxu1 %v689_v0 }
  0x43   :  { %542 = vmatpush3.bf16.msra.mxu0 %v601_v11  ;;  %562 = vmatpush3.bf16.msra.mxu1 %v610_v17 }
  0x44   :  { %567 = vmatprep.subr.bf16.mxu0 %v689_v0 }
  0x46   :  { %544 = vmatmul.mubr.bf16.vlgmr.msra.gmra.mxu0 %v602_v12 }
  0x47   :  { %583 = vmatprep.mubr.msk.bf16.mxu0 %vm690_vm0, %v689_v0  ;;  %568 = vmatpush3.bf16.msra.mxu0 %v612_v18 }
  0x48   :  { %569 = vmatprep.subr.bf16.mxu0 %v689_v0 }
  0x4b   :  { %570 = vmatpush3.bf16.msra.mxu0 %v613_v19 }
  0x4c   :  { %571 = vmatprep.subr.bf16.mxu0 %v689_v0 }
  0x4f   :  { %572 = vmatpush3.bf16.msra.mxu0 %v614_v20 }
  0x50   :  { %573 = vmatprep.subr.bf16.mxu0 %v689_v0 }
  0x53   :  { %574 = vmatpush3.bf16.msra.mxu0 %v615_v21 }
  0x54   :  { %575 = vmatprep.subr.bf16.mxu0 %v689_v0 }
  0x57   :  { %576 = vmatpush3.bf16.msra.mxu0 %v616_v22 }
  0x58   :  { %577 = vmatprep.subr.bf16.mxu0 %v689_v0 }
  0x5b   :  { %578 = vmatpush3.bf16.msra.mxu0 %v617_v34 }
  0x5c   :  { %579 = vmatprep.subr.bf16.mxu0 %v689_v0 }
  0x5f   :  { %580 = vmatpush3.bf16.msra.mxu0 %v618_v35 }
  0x60   :  { %581 = vmatprep.subr.bf16.mxu0 %v689_v0 }
  0x63   :  { %582 = vmatpush3.bf16.msra.mxu0 %v619_v36 }
 0x106   :  { %v185_v24 = vpop.f32.mrf.mxu0 }
 0x107   :  { %v186_v26 = vadd.f32 %v462_v23, %v185_v24 }
 0x108   :  { %v545_v25 = vpop.f32.mrf.mxu0 }
 0x109   :  { %v192_v30 = vmax.f32 %v186_v26, 0.0 }
 0x10a   :  { %v188_v27 = vpop.f32.mrf.mxu0 }
 0x10b   :  { %v189_v28 = vadd.f32 %v462_v23, %v188_v27 }
 0x10c   :  { %v546_v29 = vpop.f32.mrf.mxu0 }
 0x10d   :  { %v193_v31 = vmax.f32 %v189_v28, 0.0 }
 0x10f   :  { %v498_v32 = vpack.c.bf16 %v193_v31, %v192_v30 }
 0x111   :  { %499 = vst [vmem:[#allocation2] sm:$0xff] %v498_v32  }
 0x118   :  { %v611_v33 = vld [vmem:[#allocation2] sm:$0xff]  }
 0x119   :  { %564 = vmatmul.mubr.bf16.vlgmr.msra.gmra.mxu1 %v611_v33 }
 0x1d9   :  { %v319_v38 = vpop.f32.mrf.mxu1 }
 0x1da   :  { %v320_v40 = vadd.f32 %v474_v37, %v319_v38 }
 0x1db   :  { %v565_v39 = vpop.f32.mrf.mxu1 }
 0x1dc   :  { %v326_v44 = vmax.f32 %v320_v40, 0.0 }
 0x1dd   :  { %v322_v41 = vpop.f32.mrf.mxu1 }
 0x1de   :  { %v323_v42 = vadd.f32 %v474_v37, %v322_v41 }
 0x1df   :  { %v566_v43 = vpop.f32.mrf.mxu1 }
 0x1e0   :  { %v327_v45 = vmax.f32 %v323_v42, 0.0 }
 0x1e2   :  { %v328_v46 = vpack.c.bf16 %v327_v45, %v326_v44 }
 0x1e4   :  { %584 = vmatmul.mubr.bf16.vlgmr.msra.gmra.mxu0 %v328_v46 }
 0x2a4   :  { %v429_v47 = vpop.f32.mrf.mxu0 }
 0x2a5   :  { %v452_v50 = vadd.f32 %v492_v48, %v429_v47 }
 0x2a6   :  { %v585_v49 = vpop.f32.mrf.mxu0 }
 0x2a7   :  { %454 = vst [vmem:[%s795_s7] sm:$0xff] %v452_v50 }
 0x2a8   :  { %v432_v51 = vpop.f32.mrf.mxu0 }
 0x2a9   :  { %v453_v53 = vadd.f32 %v492_v48, %v432_v51 }
 0x2aa   :  { %v586_v52 = vpop.f32.mrf.mxu0 }
 0x2ab   :  { %455 = vst [vmem:[%s795_s7 + $0x8] sm:$0xff] %v453_v53 }
 0x2ac   :  { %460 = vsyncpa [#allocation4], 1 }
 0x2ad   :  { %461 = vsyncpa [#allocation6], 1 }

</bundles_post_ra>
